<compile_context>
chip_gen: v6e
topology: v6e:2x2x1
jax: 0.10.0
libtpu: 0.0.40
codegen_flags: <defaults>
</compile_context>

<pallas_src>
import functools

import jax
import jax.numpy as jnp
from jax import lax
from jax.experimental import pallas as pl
from jax.experimental.pallas import tpu as pltpu


def _round_up(x, m):
    return ((x + m - 1) // m) * m


def _const_spec(shape):
    """Grid-invariant operand: fetched once; single-buffered when supported."""
    index_map = lambda b, qi: (0,) * len(shape)
    try:
        return pl.BlockSpec(shape, index_map, pipeline_mode=pl.Buffered(1))
    except TypeError:  # older JAX without pipeline_mode on BlockSpec
        return pl.BlockSpec(shape, index_map)


def _footprint_bytes(bt, tq, s_pad, h, hp, in_elt, mm_elt, out_elt):
    """Generous per-grid-step VMEM estimate (buffers + in-body temporaries)."""
    inputs = 2 * 2 * bt * s_pad * h * in_elt            # ques+conc, double buffered
    weights = 2 * h * hp * mm_elt + 2 * hp * 4          # single-buffered constants
    outputs = 2 * bt * tq * s_pad * out_elt             # score tile, double buffered
    temps = (bt * s_pad * h * (4 + mm_elt)              # x (+ matmul cast)
             + bt * s_pad * hp * (4 + mm_elt)           # k (+ cast)
             + bt * tq * hp * (4 + mm_elt)              # q (+ cast)
             + bt * tq * h * (4 + mm_elt)               # x_q (+ cast)
             + bt * tq * s_pad * 4)                     # scores (f32)
    return inputs + weights + outputs + temps


def _pick_tiles(B, s_pad, h, hp, in_elt, mm_elt, out_elt, vmem_cap):
    """Largest (batch_tile, query_tile) whose footprint fits ~70% of VMEM."""
    budget = int(0.70 * vmem_cap)
    tq_opts = [256, 128] if s_pad % 256 == 0 else [128]
    bt_opts = [d for d in range(B, 0, -1) if B % d == 0]

    bt, tq = 1, 128
    for t in tq_opts:
        fitting = [d for d in bt_opts
                   if _footprint_bytes(d, t, s_pad, h, hp,
                                       in_elt, mm_elt, out_elt) <= budget]
        if fitting:
            bt, tq = fitting[0], t
            break
    # v7x megacore: keep >= 2 grid steps whenever the batch allows it.
    while bt > 1 and (B // bt) * (s_pad // tq) < 2:
        bt = max(d for d in bt_opts if d < bt)
    return bt, tq


def _attn_kernel(ques_ref, conc_ref, wq_ref, wk_ref, bq_ref, bk_ref, o_ref,
                 *, mm_dtype, tq):
    # ques_ref / conc_ref : (bt, S_pad, H)   float32
    # wq_ref / wk_ref     : (H, Hp)          mm_dtype   (1/sqrt(H) folded into wq)
    # bq_ref / bk_ref     : (1, Hp)          float32    (1/sqrt(H) folded into bq)
    # o_ref               : (bt, tq, S_pad)  out dtype
    _, s_pad, _ = ques_ref.shape

    # One elementwise add over the full, (8,128)-aligned slab; k needs all rows.
    x = ques_ref[...] + conc_ref[...]                       # (bt, S_pad, H) f32

    # k projection over all S_pad rows: (bt, S_pad, H) @ (H, Hp).
    k = lax.dot_general(
        x.astype(mm_dtype), wk_ref[...],
        dimension_numbers=(((2,), (0,)), ((), ())),
        preferred_element_type=jnp.float32) + bk_ref[...]   # (bt, S_pad, Hp)

    # q projection only over this query tile's rows (TQ-aligned, so the ref
    # slice starts on a sublane/tile boundary).
    if tq == s_pad:
        x_q = x
    else:
        row0 = pl.multiple_of(pl.program_id(1) * tq, tq)
        x_q = (ques_ref[:, pl.ds(row0, tq), :]
               + conc_ref[:, pl.ds(row0, tq), :])           # (bt, tq, H)
    q = lax.dot_general(
        x_q.astype(mm_dtype), wq_ref[...],
        dimension_numbers=(((2,), (0,)), ((), ())),
        preferred_element_type=jnp.float32) + bq_ref[...]   # (bt, tq, Hp)

    # Batched q @ k^T: contract the lane dims — no materialized transpose.
    scores = lax.dot_general(
        q.astype(mm_dtype), k.astype(mm_dtype),
        dimension_numbers=(((2,), (2,)), ((0,), (0,))),
        preferred_element_type=jnp.float32)                 # (bt, tq, S_pad)
    o_ref[...] = scores.astype(o_ref.dtype)


def attention_score_qc_weight(ques_state, conc_state, wq, bq, wk, bk, *,
                              matmul_dtype=jnp.bfloat16,
                              out_dtype=jnp.float32,
                              batch_tile=None, query_tile=None):
    """ques_state, conc_state: (B, S, H); wq, wk: (H, H) in PyTorch (out, in)
    layout; bq, bk: (H,). Returns attention of shape (B, S-1, S-1)."""
    B, S, H = ques_state.shape
    assert conc_state.shape == (B, S, H)
    scale = float(H) ** (-0.5)

    # ---- Layout prep (outside the kernel, amortized once) -----------------
    # Sequence padded to a multiple of 128: lane-dense score stores, no
    # sublane-offset slices in-kernel; the [:, 1:, :-1] slice happens below.
    s_pad = _round_up(max(S, 1), 128)
    # Projection-output dim padded to a multiple of 128 (input H unpadded).
    hp = _round_up(H, 128)

    ques_p = ques_state.astype(jnp.float32)
    conc_p = conc_state.astype(jnp.float32)
    if s_pad != S:
        seq_pad = [(0, 0), (0, s_pad - S), (0, 0)]
        ques_p = jnp.pad(ques_p, seq_pad)
        conc_p = jnp.pad(conc_p, seq_pad)

    # nn.Linear weights are (out, in): transpose to x @ W^T layout, fold the
    # 1/sqrt(H) scale into the q side, zero-pad output columns to Hp.
    def prep_w(w, s):
        wt = w.astype(jnp.float32).T * s                    # (H, H)
        return jnp.pad(wt, [(0, 0), (0, hp - H)]).astype(matmul_dtype)

    def prep_b(b, s):
        return jnp.pad(b.astype(jnp.float32) * s, [(0, hp - H)]).reshape(1, hp)

    wq_t, wk_t = prep_w(wq, scale), prep_w(wk, 1.0)
    bq_v, bk_v = prep_b(bq, scale), prep_b(bk, 1.0)

    # ---- Generation-aware tiling / VMEM budget -----------------------------
    try:
        vmem_cap = int(pltpu.get_tpu_info().vmem_capacity_bytes)
    except Exception:
        vmem_cap = 64 * 2**20       # conservative fallback (v7x per-core size)

    in_elt = 4
    mm_elt = jnp.dtype(matmul_dtype).itemsize
    out_elt = jnp.dtype(out_dtype).itemsize
    bt, tq = _pick_tiles(B, s_pad, H, hp, in_elt, mm_elt, out_elt, vmem_cap)
    if batch_tile is not None:
        bt = int(batch_tile)
        assert B % bt == 0, "batch_tile must divide B"
    if query_tile is not None:
        tq = int(query_tile)
        assert s_pad % tq == 0 and tq % 8 == 0, "query_tile must divide padded S"
    vmem_limit = int(0.85 * vmem_cap)   # ~54 MiB on v7x, ~108 MiB on v5e/v6e

    grid = (B // bt, s_pad // tq)
    data_map = lambda b, qi: (b, 0, 0)   # input blocks are revisited across qi

    kernel = functools.partial(_attn_kernel, mm_dtype=matmul_dtype, tq=tq)

    scores_full = pl.pallas_call(
        kernel,
        out_shape=jax.ShapeDtypeStruct((B, s_pad, s_pad), out_dtype),
        grid_spec=pltpu.PrefetchScalarGridSpec(
            num_scalar_prefetch=0,
            grid=grid,
            in_specs=[
                pl.BlockSpec((bt, s_pad, H), data_map),   # ques_state
                pl.BlockSpec((bt, s_pad, H), data_map),   # conc_state
                _const_spec((H, hp)),                     # wq^T * 1/sqrt(H)
                _const_spec((H, hp)),                     # wk^T
                _const_spec((1, hp)),                     # bq * 1/sqrt(H)
                _const_spec((1, hp)),                     # bk
            ],
            out_specs=pl.BlockSpec((bt, tq, s_pad), lambda b, qi: (b, qi, 0)),
        ),
        compiler_params=pltpu.CompilerParams(
            dimension_semantics=("parallel", "parallel"),
            vmem_limit_bytes=vmem_limit),
    )(ques_p, conc_p, wq_t, wk_t, bq_v, bk_v)

    # attention[b, i, j] = q_full[b, i+1] . k_full[b, j] * scale
    return scores_full[:, 1:S, : S - 1]


def _reference(ques_state, conc_state, wq, bq, wk, bk):
    H = ques_state.shape[-1]
    q_in = ques_state[:, 1:] + conc_state[:, 1:]
    k_in = ques_state[:, :-1] + conc_state[:, :-1]
    q = jnp.einsum("bld,od->blo", q_in, wq) + bq
    k = jnp.einsum("bld,od->blo", k_in, wk) + bk
    return jnp.einsum("bld,bmd->blm", q, k) * (float(H) ** (-0.5))


if __name__ == "__main__":
    B, S, H = 2, 8, 32

    key = jax.random.PRNGKey(0)
    k1, k2, k3, k4, k5, k6 = jax.random.split(key, 6)

    ques_state = jax.random.normal(k1, (B, S, H), dtype=jnp.float32)
    conc_state = jax.random.normal(k2, (B, S, H), dtype=jnp.float32)

    # Deterministic params (mimic nn.Linear uniform(-1/sqrt(H), 1/sqrt(H))).
    bound = 1.0 / (H ** 0.5)
    wq = jax.random.uniform(k3, (H, H), jnp.float32, -bound, bound)
    bq = jax.random.uniform(k4, (H,), jnp.float32, -bound, bound)
    wk = jax.random.uniform(k5, (H, H), jnp.float32, -bound, bound)
    bk = jax.random.uniform(k6, (H,), jnp.float32, -bound, bound)

    ref = _reference(ques_state, conc_state, wq, bq, wk, bk)

    # Exact-semantics path (f32 matmul operands): tight tolerance.
    out_f32 = attention_score_qc_weight(ques_state, conc_state, wq, bq, wk, bk,
                                        matmul_dtype=jnp.float32)
    out_f32 = jax.block_until_ready(out_f32)
    assert out_f32.shape == (B, S - 1, S - 1), out_f32.shape
    assert jnp.allclose(out_f32, ref, atol=1e-4, rtol=1e-4), (
        float(jnp.max(jnp.abs(out_f32 - ref))))

    # Default fast path (bf16 MXU operands, f32 accumulation): looser tolerance.
    out_bf16 = attention_score_qc_weight(ques_state, conc_state, wq, bq, wk, bk)
    out_bf16 = jax.block_until_ready(out_bf16)
    assert out_bf16.shape == (B, S - 1, S - 1), out_bf16.shape
    assert jnp.allclose(out_bf16, ref, atol=5e-2, rtol=5e-2), (
        float(jnp.max(jnp.abs(out_bf16 - ref))))

    print("KERNEL_OK")
</pallas_src>

<mosaic_0001>
module attributes {stable_mosaic.version = 11 : i64} {
  func.func @_attn_kernel(%arg0: i32, %arg1: i32, %arg2: memref<1x128x32xf32, #tpu.memory_space<vmem>>, %arg3: memref<1x128x32xf32, #tpu.memory_space<vmem>>, %arg4: memref<32x128xf32, #tpu.memory_space<vmem>>, %arg5: memref<32x128xf32, #tpu.memory_space<vmem>>, %arg6: memref<1x128xf32, #tpu.memory_space<vmem>>, %arg7: memref<1x128xf32, #tpu.memory_space<vmem>>, %arg8: memref<1x128x128xf32, #tpu.memory_space<vmem>>) attributes {dimension_semantics = [#tpu.dimension_semantics<parallel>, #tpu.dimension_semantics<parallel>], iteration_bounds = array<i64: 2, 1>, scalar_prefetch = 0 : i64, scratch_operands = 0 : i64, tpu.core_type = #tpu.core_type<tc>, window_params = [{transform_indices = @transform_0, window_bounds = array<i64: 1, 128, 32>}, {transform_indices = @transform_1, window_bounds = array<i64: 1, 128, 32>}, {pipeline_mode = #tpu.pipeline_mode<synchronous>, transform_indices = @transform_2, window_bounds = array<i64: 32, 128>}, {pipeline_mode = #tpu.pipeline_mode<synchronous>, transform_indices = @transform_3, window_bounds = array<i64: 32, 128>}, {pipeline_mode = #tpu.pipeline_mode<synchronous>, transform_indices = @transform_4, window_bounds = array<i64: 1, 128>}, {pipeline_mode = #tpu.pipeline_mode<synchronous>, transform_indices = @transform_5, window_bounds = array<i64: 1, 128>}, {transform_indices = @transform_6, window_bounds = array<i64: 1, 128, 128>}]} {
    %c0 = arith.constant 0 : index
    %c0_0 = arith.constant 0 : index
    %c0_1 = arith.constant 0 : index
    %0 = vector.load %arg2[%c0, %c0_0, %c0_1] : memref<1x128x32xf32, #tpu.memory_space<vmem>>, vector<1x128x32xf32>
    %c0_2 = arith.constant 0 : index
    %c0_3 = arith.constant 0 : index
    %c0_4 = arith.constant 0 : index
    %1 = vector.load %arg3[%c0_2, %c0_3, %c0_4] : memref<1x128x32xf32, #tpu.memory_space<vmem>>, vector<1x128x32xf32>
    %2 = arith.addf %0, %1 : vector<1x128x32xf32>
    %c0_5 = arith.constant 0 : index
    %c0_6 = arith.constant 0 : index
    %3 = vector.load %arg5[%c0_5, %c0_6] : memref<32x128xf32, #tpu.memory_space<vmem>>, vector<32x128xf32>
    %cst = arith.constant dense<0.000000e+00> : vector<1x128x128xf32>
    %4 = tpu.matmul %2, %3, %cst {dimension_numbers = #tpu.dot_dimension_numbers<[2], [0], [0, 1], [1], [0, 0, 0, 1, 1, 1], [], []>} : vector<1x128x32xf32>, vector<32x128xf32>, vector<1x128x128xf32> -> vector<1x128x128xf32>
    %c0_7 = arith.constant 0 : index
    %c0_8 = arith.constant 0 : index
    %5 = vector.load %arg7[%c0_7, %c0_8] : memref<1x128xf32, #tpu.memory_space<vmem>>, vector<1x128xf32>
    %6 = vector.shape_cast %5 : vector<1x128xf32> to vector<1x1x128xf32>
    %7 = vector.broadcast %6 : vector<1x1x128xf32> to vector<1x128x128xf32>
    %8 = arith.addf %4, %7 : vector<1x128x128xf32>
    %c0_9 = arith.constant 0 : index
    %c0_10 = arith.constant 0 : index
    %9 = vector.load %arg4[%c0_9, %c0_10] : memref<32x128xf32, #tpu.memory_space<vmem>>, vector<32x128xf32>
    %cst_11 = arith.constant dense<0.000000e+00> : vector<1x128x128xf32>
    %10 = tpu.matmul %2, %9, %cst_11 {dimension_numbers = #tpu.dot_dimension_numbers<[2], [0], [0, 1], [1], [0, 0, 0, 1, 1, 1], [], []>} : vector<1x128x32xf32>, vector<32x128xf32>, vector<1x128x128xf32> -> vector<1x128x128xf32>
    %c0_12 = arith.constant 0 : index
    %c0_13 = arith.constant 0 : index
    %11 = vector.load %arg6[%c0_12, %c0_13] : memref<1x128xf32, #tpu.memory_space<vmem>>, vector<1x128xf32>
    %12 = vector.shape_cast %11 : vector<1x128xf32> to vector<1x1x128xf32>
    %13 = vector.broadcast %12 : vector<1x1x128xf32> to vector<1x128x128xf32>
    %14 = arith.addf %10, %13 : vector<1x128x128xf32>
    %cst_14 = arith.constant dense<0.000000e+00> : vector<1x128x128xf32>
    %15 = tpu.matmul %14, %8, %cst_14 {dimension_numbers = #tpu.dot_dimension_numbers<[2], [2], [1], [1], [0, 0, 0, 1, 1, 1], [0], [0]>} : vector<1x128x128xf32>, vector<1x128x128xf32>, vector<1x128x128xf32> -> vector<1x128x128xf32>
    %c0_15 = arith.constant 0 : index
    %c0_16 = arith.constant 0 : index
    %c0_17 = arith.constant 0 : index
    %16 = vector.load %arg8[%c0_15, %c0_16, %c0_17] : memref<1x128x128xf32, #tpu.memory_space<vmem>>, vector<1x128x128xf32>
    tpu.vector_store %arg8[%c0_15, %c0_16, %c0_17], %15 {strides = array<i32>} : memref<1x128x128xf32, #tpu.memory_space<vmem>>, vector<1x128x128xf32>,
    return
  }
  func.func @transform_0(%arg0: i32, %arg1: i32) -> (i32, i32, i32) {
    %c0_i32 = arith.constant 0 : i32
    %c0_i32_0 = arith.constant 0 : i32
    %c0_i32_1 = arith.constant 0 : i32
    return %arg0, %c0_i32, %c0_i32_0 : i32, i32, i32
  }
  func.func @transform_1(%arg0: i32, %arg1: i32) -> (i32, i32, i32) {
    %c0_i32 = arith.constant 0 : i32
    %c0_i32_0 = arith.constant 0 : i32
    %c0_i32_1 = arith.constant 0 : i32
    return %arg0, %c0_i32, %c0_i32_0 : i32, i32, i32
  }
  func.func @transform_2(%arg0: i32, %arg1: i32) -> (i32, i32) {
    %c0_i32 = arith.constant 0 : i32
    %c0_i32_0 = arith.constant 0 : i32
    %c0_i32_1 = arith.constant 0 : i32
    return %c0_i32, %c0_i32_0 : i32, i32
  }
  func.func @transform_3(%arg0: i32, %arg1: i32) -> (i32, i32) {
    %c0_i32 = arith.constant 0 : i32
    %c0_i32_0 = arith.constant 0 : i32
    %c0_i32_1 = arith.constant 0 : i32
    return %c0_i32, %c0_i32_0 : i32, i32
  }
  func.func @transform_4(%arg0: i32, %arg1: i32) -> (i32, i32) {
    %c0_i32 = arith.constant 0 : i32
    %c0_i32_0 = arith.constant 0 : i32
    %c0_i32_1 = arith.constant 0 : i32
    return %c0_i32, %c0_i32_0 : i32, i32
  }
  func.func @transform_5(%arg0: i32, %arg1: i32) -> (i32, i32) {
    %c0_i32 = arith.constant 0 : i32
    %c0_i32_0 = arith.constant 0 : i32
    %c0_i32_1 = arith.constant 0 : i32
    return %c0_i32, %c0_i32_0 : i32, i32
  }
  func.func @transform_6(%arg0: i32, %arg1: i32) -> (i32, i32, i32) {
    %c0_i32 = arith.constant 0 : i32
    %c0_i32_0 = arith.constant 0 : i32
    return %arg0, %arg1, %c0_i32 : i32, i32, i32
  }
}

</mosaic_0001>

<bundles_post_ra>
// kernel: tpu_custom_call.1
= control target key start
LH: loop header
LB: loop body
LE: loop exit
PB: predicated region body
PF: predicated region fallthrough
CT: control target
= control target key end

     0   :  { %11 = vsyncpa [#allocation3], 0  ;;  %s1721_s0 = inlined_call_operand.vmem [shape: f32[2,128,32], index: 0, kind: input, shape index: {}]   ;;  %s1722_s1 = inlined_call_operand.vmem [shape: f32[2,128,32], index: 1, kind: input, shape index: {}]   ;;  %s1723_s2 = inlined_call_operand.vmem [shape: f32[32,128], index: 2, kind: input, shape index: {}]   ;;  %s1724_s3 = inlined_call_operand.vmem [shape: f32[32,128], index: 3, kind: input, shape index: {}]   ;;  %s1725_s4 = inlined_call_operand.vmem [shape: f32[1,128], index: 4, kind: input, shape index: {}]   ;;  %s1726_s5 = inlined_call_operand.vmem [shape: f32[1,128], index: 5, kind: input, shape index: {}]   ;;  %s1727_s6 = inlined_call_operand.hbm [shape: f32[2,128,128], index: 6, kind: output, shape index: {}]  }
   0x1   :  { %13 = vsyncpa [#allocation3 + $0x1], 0  ;;  %s1405_s21 = smov 0   ;;  %s1407_s22 = smov 0  }
   0x2   :  { %s1409_s23 = smov 0   ;;  %s1411_s24 = smov 0  }
   0x3   :  { %s1413_s25 = smov 0   ;;  %s1415_s26 = smov 0  }
   0x4 LB: > { %s956_s27 = sadd.s32 4294967295, %s1365_s26   ;;  %s957_s28 = sadd.s32 4294967294, %s1365_s26   ;;  %s1365_s26 = sphi %s1415_s26, %s19_s26   ;;  %s1361_s25 = sphi %s1413_s25, %s1734_s25   ;;  %s1357_s24 = sphi %s1411_s24, %s1733_s24   ;;  %s1353_s23 = sphi %s1409_s23, %s1732_s23   ;;  %s1349_s22 = sphi %s1407_s22, %s1731_s22   ;;  %s1345_s21 = sphi %s1405_s21, %s1730_s21  }
   0x5   : > { %s31_s29 = sadd.s32 1, %s1361_s25  ;;  %s176_s30 = sadd.s32 1, %s1353_s23 }
   0x6   : > { %p33_p0 = scmp.ge.s32.totalorder %s31_s29, 2  ;;  %p186_p1 = scmp.ne.s32.totalorder %s1353_s23, %s1349_s22 }
   0x7   : > { %p187_p2 = scmp.eq.s32.totalorder %s956_s27, 1  ;;  %p192_p3 = scmp.ne.s32.totalorder %s1349_s22, %s1345_s21 }
   0x8   : > { %s1736_s29 = smov (%p33_p0, %s31_s29), 0  ;;  %p193_p5 = scmp.eq.s32.totalorder %s957_s28, 1 }
   0x9   : > { %p1445_p4 = por %p187_p2, %p186_p1  ;;  %s171_s8 = ssub.s32 %s1361_s25, %s1736_s29 }
   0xa   : > { %p960_p6 = scmp.ge.s32.totalorder %s1365_s26, 1  ;;  %p174_p7 = scmp.eq.s32.totalorder %s171_s8, 0 }
   0xb   : > { %p1452_p8 = por %p193_p5, %p192_p3  ;;  %p239_p9 = scmp.lt.s32.totalorder %s1365_s26, 3 }
   0xc   : > { %s1458_s10 = scalar_select %p174_p7, %s1353_s23, %s176_s30  }
   0xd   : > { %p240_p10 = pnand %p960_p6, %p239_p9 }
   0xe   : > { %p274_p11 = scmp.lt.s32.totalorder (!%p240_p10), %s1357_s24, 1  ;;  %s271_s11 = sand.u32 (!%p240_p10), 1, %s1349_s22  }
   0xf   : > { %243 = sbr.rel (%p240_p10) target bundleno = 538 (0x21a), region = 44  ;;  %s1007_s14 = sshll.u32 (!%p240_p10), %s1357_s24, 11 }
  0x10   : > { %s1367_s20 = smov (!%p240_p10), [#allocation2]  }
  0x14   : > { %v336_v0 = vld [vmem:[%s1724_s3 + $0x18] sm:$0xff]  ;;  %v335_v1 = vld [vmem:[%s1724_s3 + $0x10] sm:$0xff]  ;;  %v334_v4 = vld [vmem:[%s1724_s3 + $0x8] sm:$0xff]  ;;  %s275_s27 = scalar_select %p274_p11, %s1357_s24, 1  ;;  %vm344_vm0 = vcmask 261120  }
  0x15   : > { %1080 = vmatprep.subr.mxu0 %v336_v0  ;;  %v541_v2 = vld [vmem:[%s1723_s2 + $0x18] sm:$0xff]  ;;  %v540_v3 = vld [vmem:[%s1723_s2 + $0x10] sm:$0xff]  ;;  %v539_v5 = vld [vmem:[%s1723_s2 + $0x8] sm:$0xff]  ;;  %s1676_s24 = scalar_lea.sflag [#allocation3], %s271_s11 }
  0x16   : > { %1081 = vmatpush3.msra.mxu0 %v336_v0  ;;  %1112 = vmatprep.subr.mxu1 %v541_v2  ;;  %v333_v6 = vld [vmem:[%s1724_s3] sm:$0xff]  ;;  %s1005_s12 = sshll.u32 %s275_s27, 7  ;;  %s1293_s27 = sshll.u32 %s1367_s20, 4  ;;  %s1294_s27 = int_to_ptr.vmem [resolvable:$false] %s1293_s27 }
  0x17   : > { %1082 = vmatprep.subr.mxu0 %v335_v1  ;;  %1113 = vmatpush3.msra.mxu1 %v541_v2  ;;  %s1486_s15 = scalar_lea.vmem %s1721_s0, %s1005_s12  ;;  %s1491_s18 = scalar_lea.vmem %s1722_s1, %s1005_s12  ;;  %v538_v7 = vld [vmem:[%s1723_s2] sm:$0xff] }
  0x18   : > { %1083 = vmatpush3.msra.mxu0 %v335_v1  ;;  %1114 = vmatprep.subr.mxu1 %v540_v3  ;;  %v285_v8 = vld [vmem:[%s1486_s15] sm:$0xff]  ;;  %v286_v10 = vld [vmem:[%s1486_s15 + $0x8] sm:$0xff]  ;;  %v287_v13 = vld [vmem:[%s1486_s15 + $0x10] sm:$0xff]  ;;  %s961_s12 = sshll.u32 %s271_s11, 7  ;;  %s1295_s28 = scalar_lea.vmem %s1294_s27, 4096 }
  0x19   : > { %1084 = vmatprep.subr.mxu0 %v334_v4  ;;  %1115 = vmatpush3.msra.mxu1 %v540_v3  ;;  %v301_v9 = vld [vmem:[%s1491_s18] sm:$0xff]  ;;  %v302_v12 = vld [vmem:[%s1491_s18 + $0x8] sm:$0xff]  ;;  %v303_v14 = vld [vmem:[%s1491_s18 + $0x10] sm:$0xff]  ;;  %s1647_s13 = scalar_lea.vmem [#allocation2], %s961_s12 }
  0x1a   : > { %1085 = vmatpush3.msra.mxu0 %v334_v4  ;;  %1116 = vmatprep.subr.mxu1 %v539_v5  ;;  %v317_v11 = vadd.f32 %v301_v9, %v285_v8  ;;  %v318_v15 = vadd.f32 %v302_v12, %v286_v10  ;;  %v319_v16 = vadd.f32 %v303_v14, %v287_v13  ;;  %v288_v17 = vld [vmem:[%s1486_s15 + $0x18] sm:$0xff]  ;;  %v289_v19 = vld [vmem:[%s1486_s15 + $0x20] sm:$0xff]  ;;  %v290_v23 = vld [vmem:[%s1486_s15 + $0x28] sm:$0xff] }
  0x1b   : > { %1086 = vmatprep.subr.mxu0 %v333_v6  ;;  %1117 = vmatpush3.msra.mxu1 %v539_v5  ;;  %v304_v18 = vld [vmem:[%s1491_s18 + $0x18] sm:$0xff]  ;;  %v305_v20 = vld [vmem:[%s1491_s18 + $0x20] sm:$0xff]  ;;  %v306_v24 = vld [vmem:[%s1491_s18 + $0x28] sm:$0xff] }
  0x1c   : > { %1087 = vmatpush3.msra.mxu0 %v333_v6  ;;  %1118 = vmatprep.subr.mxu1 %v538_v7  ;;  %v320_v21 = vadd.f32 %v304_v18, %v288_v17  ;;  %v321_v22 = vadd.f32 %v305_v20, %v289_v19  ;;  %v291_v25 = vld [vmem:[%s1486_s15 + $0x30] sm:$0xff]  ;;  %v322_v27 = vadd.f32 %v306_v24, %v290_v23  ;;  %v292_v29 = vld [vmem:[%s1486_s15 + $0x38] sm:$0xff]  ;;  %v293_v31 = vld [vmem:[%s1486_s15 + $0x40] sm:$0xff] }
  0x1d   : > { %1088 = vmatprep.mubr.msk.f32.mxu0 %vm344_vm0, %v317_v11  ;;  %1119 = vmatpush3.msra.mxu1 %v538_v7  ;;  %v307_v26 = vld [vmem:[%s1491_s18 + $0x30] sm:$0xff]  ;;  %v308_v30 = vld [vmem:[%s1491_s18 + $0x38] sm:$0xff]  ;;  %v309_v32 = vld [vmem:[%s1491_s18 + $0x40] sm:$0xff] }
  0x1e   : > { %1089 = vmatmul.mubr.msk.f32.vlgmr.msra.gmra.mxu0 %vm344_vm0, %v318_v15  ;;  %1120 = vmatprep.mubr.msk.f32.mxu1 %vm344_vm0, %v317_v11  ;;  %v323_v28 = vadd.f32 %v307_v26, %v291_v25  ;;  %v324_v33 = vadd.f32 %v308_v30, %v292_v29  ;;  %v325_v34 = vadd.f32 %v309_v32, %v293_v31  ;;  %v294_v35 = vld [vmem:[%s1486_s15 + $0x48] sm:$0xff]  ;;  %v295_v37 = vld [vmem:[%s1486_s15 + $0x50] sm:$0xff]  ;;  %v296_v41 = vld [vmem:[%s1486_s15 + $0x58] sm:$0xff] }
  0x1f   : > { %1091 = vmatprep.mubr.msk.f32.mxu0 %vm344_vm0, %v319_v16  ;;  %1121 = vmatmul.mubr.msk.f32.vlgmr.msra.gmra.mxu1 %vm344_vm0, %v318_v15  ;;  %v310_v36 = vld [vmem:[%s1491_s18 + $0x48] sm:$0xff]  ;;  %v311_v38 = vld [vmem:[%s1491_s18 + $0x50] sm:$0xff]  ;;  %v312_v42 = vld [vmem:[%s1491_s18 + $0x58] sm:$0xff] }
  0x20   : > { %1123 = vmatprep.mubr.msk.f32.mxu1 %vm344_vm0, %v319_v16  ;;  %v326_v39 = vadd.f32 %v310_v36, %v294_v35  ;;  %v327_v40 = vadd.f32 %v311_v38, %v295_v37  ;;  %v297_v43 = vld [vmem:[%s1486_s15 + $0x60] sm:$0xff]  ;;  %v328_v45 = vadd.f32 %v312_v42, %v296_v41  ;;  %v298_v47 = vld [vmem:[%s1486_s15 + $0x68] sm:$0xff]  ;;  %v299_v49 = vld [vmem:[%s1486_s15 + $0x70] sm:$0xff] }
  0x21   : > { %v313_v44 = vld [vmem:[%s1491_s18 + $0x60] sm:$0xff]  ;;  %v314_v48 = vld [vmem:[%s1491_s18 + $0x68] sm:$0xff]  ;;  %v315_v50 = vld [vmem:[%s1491_s18 + $0x70] sm:$0xff] }
  0x22   : > { %1092 = vmatmul.mubr.msk.f32.gmra.mxu0 %vm344_vm0, %v320_v21  ;;  %v329_v46 = vadd.f32 %v313_v44, %v297_v43  ;;  %v330_v51 = vadd.f32 %v314_v48, %v298_v47  ;;  %v331_v52 = vadd.f32 %v315_v50, %v299_v49  ;;  %v300_v53 = vld [vmem:[%s1486_s15 + $0x78] sm:$0xff]  ;;  %v1563_v56 = vld [vmem:[%s1725_s4] ss:$0 sm:$0xff]  ;;  %s871_s15 = sshll.u32 %s1647_s13, 4  ;;  %s1668_s15 = int_to_ptr.vmem [resolvable:$true] %s871_s15 }
  0x23   : > { %1094 = vmatprep.mubr.msk.f32.mxu0 %vm344_vm0, %v321_v22  ;;  %1124 = vmatmul.mubr.msk.f32.gmra.mxu1 %vm344_vm0, %v320_v21  ;;  %v316_v54 = vld [vmem:[%s1491_s18 + $0x78] sm:$0xff]  ;;  %s1666_s18 = scalar_lea.hbm %s1727_s6, %s1007_s14  ;;  %s1289_s19 = scalar_lea.vmem %s1668_s15, 2048 }
  0x24   : > { %1126 = vmatprep.mubr.msk.f32.mxu1 %vm344_vm0, %v321_v22  ;;  %v332_v55 = vadd.f32 %v316_v54, %v300_v53  ;;  %p1290_p12 = scmp.ne.s32.totalorder %s1668_s15, %s1289_s19  ;;  %p1296_p1 = scmp.lt.s32.totalorder %s1668_s15, %s1294_s27 }
  0x25   : > { %p1297_p2 = scmp.lt.s32.totalorder %s1295_s28, %s1289_s19 }
  0x26   : > { %1095 = vmatmul.mubr.msk.f32.gmra.mxu0 %vm344_vm0, %v322_v27  ;;  %p1291_p13 = pnand %p1290_p12, %p1445_p4 }
  0x27   : > { %1097 = vmatprep.mubr.msk.f32.mxu0 %vm344_vm0, %v323_v28  ;;  %1127 = vmatmul.mubr.msk.f32.gmra.mxu1 %vm344_vm0, %v322_v27  ;;  %v1606_v27 = vld [vmem:[%s1726_s5] ss:$0 sm:$0xff]  ;;  %p1298_p3 = por %p1297_p2, %p1296_p1 }
  0x28   : > { %1129 = vmatprep.mubr.msk.f32.mxu1 %vm344_vm0, %v323_v28  ;;  %p1292_p0 = pneg %p1291_p13 }
  0x2a   : > { %1098 = vmatmul.mubr.msk.f32.gmra.mxu0 %vm344_vm0, %v324_v33  ;;  %p1299_p5 = pnand %p1298_p3, %p1292_p0 }
  0x2b   : > { %1100 = vmatprep.mubr.msk.f32.mxu0 %vm344_vm0, %v325_v34  ;;  %1130 = vmatmul.mubr.msk.f32.gmra.mxu1 %vm344_vm0, %v324_v33 }
  0x2c   : > { %1132 = vmatprep.mubr.msk.f32.mxu1 %vm344_vm0, %v325_v34 }
  0x2e   : > { %1101 = vmatmul.mubr.msk.f32.gmra.mxu0 %vm344_vm0, %v326_v39 }
  0x2f   : > { %1103 = vmatprep.mubr.msk.f32.mxu0 %vm344_vm0, %v327_v40  ;;  %1133 = vmatmul.mubr.msk.f32.gmra.mxu1 %vm344_vm0, %v326_v39 }
  0x30   : > { %1135 = vmatprep.mubr.msk.f32.mxu1 %vm344_vm0, %v327_v40 }
  0x32   : > { %1104 = vmatmul.mubr.msk.f32.gmra.mxu0 %vm344_vm0, %v328_v45 }
  0x33   : > { %1106 = vmatprep.mubr.msk.f32.mxu0 %vm344_vm0, %v329_v46  ;;  %1136 = vmatmul.mubr.msk.f32.gmra.mxu1 %vm344_vm0, %v328_v45 }
  0x34   : > { %1138 = vmatprep.mubr.msk.f32.mxu1 %vm344_vm0, %v329_v46 }
  0x36   : > { %1107 = vmatmul.mubr.msk.f32.gmra.mxu0 %vm344_vm0, %v330_v51 }
  0x37   : > { %1109 = vmatprep.mubr.msk.f32.mxu0 %vm344_vm0, %v331_v52  ;;  %1139 = vmatmul.mubr.msk.f32.gmra.mxu1 %vm344_vm0, %v330_v51 }
  0x38   : > { %1141 = vmatprep.mubr.msk.f32.mxu1 %vm344_vm0, %v331_v52 }
  0x3a   : > { %1110 = vmatmul.mubr.msk.f32.gmra.mxu0 %vm344_vm0, %v332_v55 }
  0x3b   : > { %1142 = vmatmul.mubr.msk.f32.gmra.mxu1 %vm344_vm0, %v332_v55 }
  0xde   : > { %v1565_v57 = vpop.f32.mrf.mxu0 }
  0xdf   : > { %v1122_v58 = vpop.f32.mrf.mxu1  ;;  %v465_v46 = vadd.f32 %v1565_v57, %v1606_v27 }
  0xe0   : > { %v1567_v59 = vpop.f32.mrf.mxu0  ;;  %v1570_v60 = vadd.f32 %v1122_v58, %v1563_v56 }
  0xe1   : > { %v615_v61 = vpop.f32.mrf.mxu1  ;;  %v460_v48 = vadd.f32 %v1606_v27, %v1567_v59 }
  0xe2   : > { %v1572_v62 = vpop.f32.mrf.mxu0  ;;  %v616_v63 = vadd.f32 %v1563_v56, %v615_v61 }
  0xe3   : > { %v1125_v0 = vpop.f32.mrf.mxu1  ;;  %v475_v42 = vadd.f32 %v1572_v62, %v1606_v27 }
  0xe4   : > { %v1575_v1 = vpop.f32.mrf.mxu0  ;;  %v1578_v2 = vadd.f32 %v1125_v0, %v1563_v56  ;;  %1176 = vmatprep.mubr.f32.mxu0 %v616_v63 }
  0xe5   : > { %v625_v3 = vpop.f32.mrf.mxu1  ;;  %v470_v44 = vadd.f32 %v1606_v27, %v1575_v1 }
  0xe6   : > { %v1580_v4 = vpop.f32.mrf.mxu0  ;;  %v1583_v5 = vadd.f32 %v1563_v56, %v625_v3 }
  0xe7   : > { %v1128_v6 = vpop.f32.mrf.mxu1  ;;  %v485_v40 = vadd.f32 %v1580_v4, %v1606_v27 }
  0xe8   : > { %v1585_v7 = vpop.f32.mrf.mxu0  ;;  %v1588_v8 = vadd.f32 %v1128_v6, %v1563_v56 }
  0xe9   : > { %v635_v9 = vpop.f32.mrf.mxu1  ;;  %v480_v41 = vadd.f32 %v1606_v27, %v1585_v7 }
  0xea   : > { %v1099_v10 = vpop.f32.mrf.mxu0  ;;  %v1591_v11 = vadd.f32 %v1563_v56, %v635_v9 }
  0xeb   : > { %v1131_v12 = vpop.f32.mrf.mxu1  ;;  %v495_v38 = vadd.f32 %v1099_v10, %v1606_v27 }
  0xec   : > { %v489_v13 = vpop.f32.mrf.mxu0  ;;  %v1594_v14 = vadd.f32 %v1131_v12, %v1563_v56 }
  0xed   : > { %v645_v15 = vpop.f32.mrf.mxu1  ;;  %v490_v39 = vadd.f32 %v1606_v27, %v489_v13 }
  0xee   : > { %v1102_v16 = vpop.f32.mrf.mxu0  ;;  %v1597_v17 = vadd.f32 %v1563_v56, %v645_v15 }
  0xef   : > { %v1134_v18 = vpop.f32.mrf.mxu1  ;;  %v505_v36 = vadd.f32 %v1102_v16, %v1606_v27 }
  0xf0   : > { %v499_v19 = vpop.f32.mrf.mxu0  ;;  %v1600_v20 = vadd.f32 %v1134_v18, %v1563_v56 }
  0xf1   : > { %v655_v21 = vpop.f32.mrf.mxu1  ;;  %v500_v37 = vadd.f32 %v1606_v27, %v499_v19 }
  0xf2   : > { %v1105_v22 = vpop.f32.mrf.mxu0  ;;  %v656_v23 = vadd.f32 %v1563_v56, %v655_v21 }
  0xf3   : > { %v515_v34 = vadd.f32 %v1105_v22, %v1606_v27  ;;  %v1137_v43 = vpop.f32.mrf.mxu1 }
  0xf4   : > { %v509_v24 = vpop.f32.mrf.mxu0  ;;  %1188 = vmatprep.mubr.f32.mxu1 %v656_v23  ;;  %v671_v53 = vadd.f32 %v1137_v43, %v1563_v56 }
  0xf5   : > { %v510_v35 = vadd.f32 %v1606_v27, %v509_v24  ;;  %v665_v45 = vpop.f32.mrf.mxu1 }
  0xf6   : > { %v1108_v25 = vpop.f32.mrf.mxu0  ;;  %v666_v50 = vadd.f32 %v1563_v56, %v665_v45 }
  0xf7   : > { %v525_v32 = vadd.f32 %v1108_v25, %v1606_v27  ;;  %v1140_v47 = vpop.f32.mrf.mxu1 }
  0xf8   : > { %v519_v26 = vpop.f32.mrf.mxu0  ;;  %v681_v57 = vadd.f32 %v1140_v47, %v1563_v56 }
  0xf9   : > { %v520_v33 = vadd.f32 %v1606_v27, %v519_v26  ;;  %v675_v49 = vpop.f32.mrf.mxu1 }
  0xfa   : > { %v1111_v28 = vpop.f32.mrf.mxu0  ;;  %v676_v52 = vadd.f32 %v1563_v56, %v675_v49 }
  0xfb   : > { %v535_v29 = vadd.f32 %v1111_v28, %v1606_v27  ;;  %v1143_v51 = vpop.f32.mrf.mxu1 }
  0xfc   : > { %v529_v30 = vpop.f32.mrf.mxu0  ;;  %v691_v58 = vadd.f32 %v1143_v51, %v1563_v56 }
  0xfd   : > { %v530_v31 = vadd.f32 %v1606_v27, %v529_v30  ;;  %1144 = vmatprep.subr.mxu0 %v535_v29  ;;  %1200 = vmatprep.subr.mxu1 %v535_v29  ;;  %v685_v54 = vpop.f32.mrf.mxu1 }
  0xfe   : > { %1145 = vmatpush3.xpose.msra.mxu0 %v535_v29  ;;  %1216 = vmatpush3.xpose.msra.mxu1 %v535_v29  ;;  %v686_v55 = vadd.f32 %v1563_v56, %v685_v54 }
  0xff   : > { %1146 = vmatprep.subr.mxu0 %v530_v31  ;;  %1201 = vmatprep.subr.mxu1 %v530_v31 }
 0x102   : > { %1147 = vmatpush3.xpose.msra.mxu0 %v530_v31  ;;  %1217 = vmatpush3.xpose.msra.mxu1 %v530_v31 }
 0x103   : > { %1148 = vmatprep.subr.mxu0 %v525_v32  ;;  %1202 = vmatprep.subr.mxu1 %v525_v32 }
 0x106   : > { %1149 = vmatpush3.xpose.msra.mxu0 %v525_v32  ;;  %1218 = vmatpush3.xpose.msra.mxu1 %v525_v32 }
 0x107   : > { %1150 = vmatprep.subr.mxu0 %v520_v33  ;;  %1203 = vmatprep.subr.mxu1 %v520_v33 }
 0x10a   : > { %1151 = vmatpush3.xpose.msra.mxu0 %v520_v33  ;;  %1219 = vmatpush3.xpose.msra.mxu1 %v520_v33 }
 0x10b   : > { %1152 = vmatprep.subr.mxu0 %v515_v34  ;;  %1204 = vmatprep.subr.mxu1 %v515_v34 }
 0x10e   : > { %1153 = vmatpush3.xpose.msra.mxu0 %v515_v34  ;;  %1220 = vmatpush3.xpose.msra.mxu1 %v515_v34 }
 0x10f   : > { %1154 = vmatprep.subr.mxu0 %v510_v35  ;;  %1205 = vmatprep.subr.mxu1 %v510_v35 }
 0x112   : > { %1155 = vmatpush3.xpose.msra.mxu0 %v510_v35  ;;  %1221 = vmatpush3.xpose.msra.mxu1 %v510_v35 }
 0x113   : > { %1156 = vmatprep.subr.mxu0 %v505_v36  ;;  %1206 = vmatprep.subr.mxu1 %v505_v36 }
 0x116   : > { %1157 = vmatpush3.xpose.msra.mxu0 %v505_v36  ;;  %1222 = vmatpush3.xpose.msra.mxu1 %v505_v36 }
 0x117   : > { %1158 = vmatprep.subr.mxu0 %v500_v37  ;;  %1207 = vmatprep.subr.mxu1 %v500_v37 }
 0x11a   : > { %1159 = vmatpush3.xpose.msra.mxu0 %v500_v37  ;;  %1223 = vmatpush3.xpose.msra.mxu1 %v500_v37 }
 0x11b   : > { %1160 = vmatprep.subr.mxu0 %v495_v38  ;;  %1208 = vmatprep.subr.mxu1 %v495_v38 }
 0x11e   : > { %1161 = vmatpush3.xpose.msra.mxu0 %v495_v38  ;;  %1224 = vmatpush3.xpose.msra.mxu1 %v495_v38 }
 0x11f   : > { %1162 = vmatprep.subr.mxu0 %v490_v39  ;;  %1209 = vmatprep.subr.mxu1 %v490_v39 }
 0x122   : > { %1163 = vmatpush3.xpose.msra.mxu0 %v490_v39  ;;  %1225 = vmatpush3.xpose.msra.mxu1 %v490_v39 }
 0x123   : > { %1164 = vmatprep.subr.mxu0 %v485_v40  ;;  %1210 = vmatprep.subr.mxu1 %v485_v40 }
 0x126   : > { %1165 = vmatpush3.xpose.msra.mxu0 %v485_v40  ;;  %1226 = vmatpush3.xpose.msra.mxu1 %v485_v40 }
 0x127   : > { %1166 = vmatprep.subr.mxu0 %v480_v41  ;;  %1211 = vmatprep.subr.mxu1 %v480_v41 }
 0x12a   : > { %1167 = vmatpush3.xpose.msra.mxu0 %v480_v41  ;;  %1227 = vmatpush3.xpose.msra.mxu1 %v480_v41 }
 0x12b   : > { %1168 = vmatprep.subr.mxu0 %v475_v42  ;;  %1212 = vmatprep.subr.mxu1 %v475_v42 }
 0x12e   : > { %1169 = vmatpush3.xpose.msra.mxu0 %v475_v42  ;;  %1228 = vmatpush3.xpose.msra.mxu1 %v475_v42 }
 0x12f   : > { %1170 = vmatprep.subr.mxu0 %v470_v44  ;;  %1213 = vmatprep.subr.mxu1 %v470_v44 }
 0x132   : > { %1171 = vmatpush3.xpose.msra.mxu0 %v470_v44  ;;  %1229 = vmatpush3.xpose.msra.mxu1 %v470_v44 }
 0x133   : > { %1172 = vmatprep.subr.mxu0 %v465_v46  ;;  %1214 = vmatprep.subr.mxu1 %v465_v46 }
 0x136   : > { %1173 = vmatpush3.xpose.msra.mxu0 %v465_v46  ;;  %1230 = vmatpush3.xpose.msra.mxu1 %v465_v46 }
 0x137   : > { %1174 = vmatprep.subr.mxu0 %v460_v48  ;;  %1215 = vmatprep.subr.mxu1 %v460_v48 }
 0x13a   : > { %1175 = vmatpush3.xpose.msra.mxu0 %v460_v48  ;;  %1231 = vmatpush3.xpose.msra.mxu1 %v460_v48 }
 0x13d   : > { %1177 = vmatmul.mubr.f32.vlgmr.msra.gmra.mxu0 %v1570_v60  ;;  %1189 = vmatmul.mubr.f32.vlgmr.msra.gmra.mxu1 %v1600_v20 }
 0x13e   : > { %1179 = vmatprep.mubr.f32.mxu0 %v1583_v5  ;;  %1191 = vmatprep.mubr.f32.mxu1 %v666_v50 }
 0x141   : > { %1180 = vmatmul.mubr.f32.gmra.mxu0 %v1578_v2  ;;  %1192 = vmatmul.mubr.f32.gmra.mxu1 %v671_v53 }
 0x142   : > { %1182 = vmatprep.mubr.f32.mxu0 %v1591_v11  ;;  %1194 = vmatprep.mubr.f32.mxu1 %v676_v52 }
 0x145   : > { %1183 = vmatmul.mubr.f32.gmra.mxu0 %v1588_v8  ;;  %1195 = vmatmul.mubr.f32.gmra.mxu1 %v681_v57 }
 0x146   : > { %1185 = vmatprep.mubr.f32.mxu0 %v1597_v17  ;;  %1197 = vmatprep.mubr.f32.mxu1 %v686_v55 }
 0x149   : > { %1186 = vmatmul.mubr.f32.gmra.mxu0 %v1594_v14  ;;  %1198 = vmatmul.mubr.f32.gmra.mxu1 %v691_v58 }
 0x1fd   : > { %v1178_v59 = vpop.f32.mrf.mxu0  ;;  %v1190_v60 = vpop.f32.mrf.mxu1 }
 0x1fe   : > { %840 = vst [vmem:[%s1647_s13 + $0x8] sm:$0xff] %v1178_v59  ;;  %848 = vst [vmem:[%s1647_s13 + $0x48] sm:$0xff] %v1190_v60 }
 0x1ff   : > { %v760_v56 = vpop.f32.mrf.mxu0  ;;  %v800_v61 = vpop.f32.mrf.mxu1 }
 0x200   : > { %839 = vst [vmem:[%s1647_s13] sm:$0xff] %v760_v56  ;;  %847 = vst [vmem:[%s1647_s13 + $0x40] sm:$0xff] %v800_v61 }
 0x201   : > { %v1181_v62 = vpop.f32.mrf.mxu0  ;;  %v1193_v63 = vpop.f32.mrf.mxu1 }
 0x202   : > { %842 = vst [vmem:[%s1647_s13 + $0x18] sm:$0xff] %v1181_v62  ;;  %850 = vst [vmem:[%s1647_s13 + $0x58] sm:$0xff] %v1193_v63 }
 0x203   : > { %v770_v0 = vpop.f32.mrf.mxu0  ;;  %v810_v1 = vpop.f32.mrf.mxu1 }
 0x204   : > { %841 = vst [vmem:[%s1647_s13 + $0x10] sm:$0xff] %v770_v0  ;;  %849 = vst [vmem:[%s1647_s13 + $0x50] sm:$0xff] %v810_v1 }
 0x205   : > { %v1184_v2 = vpop.f32.mrf.mxu0  ;;  %v1196_v3 = vpop.f32.mrf.mxu1 }
 0x206   : > { %844 = vst [vmem:[%s1647_s13 + $0x28] sm:$0xff] %v1184_v2  ;;  %852 = vst [vmem:[%s1647_s13 + $0x68] sm:$0xff] %v1196_v3 }
 0x207   : > { %v780_v4 = vpop.f32.mrf.mxu0  ;;  %v820_v5 = vpop.f32.mrf.mxu1 }
 0x208   : > { %843 = vst [vmem:[%s1647_s13 + $0x20] sm:$0xff] %v780_v4  ;;  %851 = vst [vmem:[%s1647_s13 + $0x60] sm:$0xff] %v820_v5 }
 0x209   : > { %v1187_v6 = vpop.f32.mrf.mxu0  ;;  %v1199_v7 = vpop.f32.mrf.mxu1 }
 0x20a   : > { %846 = vst [vmem:[%s1647_s13 + $0x38] sm:$0xff] %v1187_v6  ;;  %854 = vst [vmem:[%s1647_s13 + $0x78] sm:$0xff] %v1199_v7 }
 0x20b   : > { %v790_v8 = vpop.f32.mrf.mxu0  ;;  %v830_v9 = vpop.f32.mrf.mxu1 }
 0x20c   : > { %845 = vst [vmem:[%s1647_s13 + $0x30] sm:$0xff] %v790_v8  ;;  %853 = vst [vmem:[%s1647_s13 + $0x70] sm:$0xff] %v830_v9 }
 0x20d   : > { %1302 = shalt.err (!%p1299_p5)
}
 0x20e   : > { %s1303_s30 = scalar_lea.hbm %s1666_s18, 2048  ;;  %s1307_s12 = scalar_lea.hbm %s1727_s6, 4096 }
 0x20f   : > { %p1304_p6 = scmp.ne.s32.totalorder %s1666_s18, %s1303_s30  ;;  %p1308_p10 = scmp.lt.s32.totalorder %s1666_s18, %s1727_s6 }
 0x210   : > { %p1309_p11 = scmp.lt.s32.totalorder %s1307_s12, %s1303_s30 }
 0x211   : > { %p1305_p7 = pnand %p1304_p6, %p1445_p4 }
 0x212   : > { %p1310_p12 = por %p1309_p11, %p1308_p10 }
 0x213   : > { %p1306_p9 = pneg %p1305_p7 }
 0x215   : > { %p1311_p13 = pnand %p1310_p12, %p1306_p9 }
 0x217   : > { %1314 = shalt.err (!%p1311_p13)
}
 0x218   : > { %s1368_s16 = smov 128   ;;  %s1369_s17 = smov 8  }
 0x219   : > { %1232 = dma.vmem_to_hbm [thread:$0]  (%p1445_p4), %s1668_s15, 2048, %s1666_s18, %s1676_s24, %s1368_s16, %s1368_s16, %s1369_s17  }
 0x21a PF: > { %p1238_p0 = scmp.ge.s32.totalorder %s1365_s26, 2  ;;  %s886_s19 = sand.u32 1, %s1345_s21  }
 0x21b   : > { %s887_s20 = scalar_lea.sflag [#allocation3], %s886_s19 }
 0x21c   : > { %p1235_p1 = pnand %p1238_p0, %p1452_p8 }
 0x21e   : > { %p1236_p2 = pneg %p1235_p1 }
 0x220   : > { %1340 = dma.done.wait (%p1236_p2), %s887_s20, 2048  }
 0x221   : > { %1342 = vsyncadd (%p1236_p2), %s887_s20, 4294965248  ;;  %s19_s26 = sadd.s32 1, %s1365_s26   ;;  %s1730_s21 = smov %s1349_s22 }
 0x222   : > { %p16_p3 = scmp.ge.s32.totalorder %s19_s26, 4   ;;  %s1731_s22 = smov %s1353_s23 }
 0x223   : > { %s1732_s23 = smov %s1458_s10  ;;  %s1733_s24 = smov %s1361_s25 }
 0x224   : > { %s1734_s25 = smov %s1736_s29  ;;  %18 = sbr.rel (!%p16_p3) target bundleno = 4 (0x4), region = 82 }
 0x229   :  { %892 = vsyncpa [#allocation3], 1 }
 0x22a   :  { %894 = vsyncpa [#allocation3 + $0x1], 1 }

</bundles_post_ra>
